<compile_context>
chip_gen: v7x
topology: tpu7x:2x2x1
jax: 0.10.0
libtpu: 0.0.40
codegen_flags: <defaults>
</compile_context>

<pallas_src>
import jax
import jax.numpy as jnp
from jax.experimental import pallas as pl
from jax.experimental.pallas import tpu as pltpu


_LANES = 512        # lane-dense last dim (multiple of 128 -> unmasked stores)
_BLOCK_ROWS = 512   # (512, 512) f32 tile = 1 MiB; 2 inputs x 2 buffers = 4 MiB VMEM


def _cdiv(a, b):
    return -(-a // b)


def _round_up(a, b):
    return _cdiv(a, b) * b


# ----------------------------------------------------------------------------
# Kernel: partial sum of (x - gt)^2 over a tiled grid
# ----------------------------------------------------------------------------
def _mse_partial_kernel(x_ref, gt_ref, psum_ref, acc_ref):
    """grid = (n_par, tiles_per_par).

    Axis 0 ("parallel"): independent row-tile groups (sharded across
    TensorCores on v7x).  Axis 1 ("arbitrary"): reduction over row tiles.
    acc_ref: (1, 1) f32 VMEM scratch, persistent across the reduction axis.
    psum_ref: (1, 8, 128) per-parallel-slice output block, written once on
    the final reduction step (full-tile, lane-dense store).
    """
    i = pl.program_id(1)

    @pl.when(i == 0)
    def _init():
        acc_ref[...] = jnp.zeros_like(acc_ref)

    # Accumulate in f32 regardless of input dtype (bf16-safe).
    d = x_ref[...].astype(jnp.float32) - gt_ref[...].astype(jnp.float32)
    acc_ref[...] += jnp.sum(d * d)

    @pl.when(i == pl.num_programs(1) - 1)
    def _finalize():
        psum_ref[...] = jnp.broadcast_to(acc_ref[...], psum_ref.shape)


# ----------------------------------------------------------------------------
# Wrapper
# ----------------------------------------------------------------------------
@jax.jit
def _pallas_mse(x, gt):
    """mean((x - gt)**2) over all elements via a tiled Pallas reduction."""
    n_elem = x.size
    x_flat = x.reshape(-1)
    gt_flat = gt.reshape(-1)

    # Lane-dense layout: (rows, 512).  Pick tile / parallelism from the size.
    rows = _cdiv(n_elem, _LANES)
    n_tiles = _cdiv(rows, _BLOCK_ROWS)
    if n_tiles == 1:
        block_rows = _round_up(rows, 8)   # single small block, sublane-aligned
        n_par = 1
    else:
        block_rows = _BLOCK_ROWS
        n_par = 2                         # let v7x's 2 TensorCores split tiles
    tiles_per_par = _cdiv(n_tiles, n_par)
    padded_rows = n_par * tiles_per_par * block_rows
    pad = padded_rows * _LANES - n_elem

    # Zero padding is exact for the sum of squared differences.
    x2d = jnp.pad(x_flat, (0, pad)).reshape(padded_rows, _LANES)
    gt2d = jnp.pad(gt_flat, (0, pad)).reshape(padded_rows, _LANES)

    in_map = lambda p, i: (p * tiles_per_par + i, 0)

    partials = pl.pallas_call(
        _mse_partial_kernel,
        out_shape=jax.ShapeDtypeStruct((n_par, 8, 128), jnp.float32),
        grid=(n_par, tiles_per_par),
        in_specs=[
            pl.BlockSpec((block_rows, _LANES), in_map),
            pl.BlockSpec((block_rows, _LANES), in_map),
        ],
        out_specs=pl.BlockSpec((1, 8, 128), lambda p, i: (p, 0, 0)),
        scratch_shapes=[pltpu.VMEM((1, 1), jnp.float32)],
        compiler_params=pltpu.CompilerParams(
            dimension_semantics=("parallel", "arbitrary")),
    )(x2d, gt2d)

    # Deferred mean: combine the n_par partial sums and scale by 1/N once.
    return jnp.sum(partials[:, 0, 0]) * (1.0 / n_elem)


class BaseModelPallas:
    """Concrete Pallas-backed stand-in for the abstract BaseModel."""

    def __init__(self, opt=None, loss="mse"):
        self.opt = opt
        self.loss = loss
        # BaseModel.__init__ declares no parameters; nothing to initialize.

    def forward(self, x, gt=None, **kwargs):
        # Base-class contract: (prediction, ...) plus a loss entry when gt is
        # given.  prediction == input here, so return x directly instead of
        # paying an HBM read+write for an identity copy.
        outputs = (x,)
        if gt is not None:
            outputs += (_pallas_mse(x, gt),)
        return outputs

    __call__ = forward


# ----------------------------------------------------------------------------
# Demo
# ----------------------------------------------------------------------------
if __name__ == "__main__":
    key = jax.random.PRNGKey(0)
    k1, k2 = jax.random.split(key)
    x = jax.random.normal(k1, (2, 4, 16, 16), dtype=jnp.float32)
    gt = jax.random.normal(k2, (2, 4, 16, 16), dtype=jnp.float32)

    model = BaseModelPallas(opt=None, loss="mse")

    # Without gt: outputs == (prediction,)
    (pred,) = model(x)
    pred = jax.block_until_ready(pred)
    assert pred.shape == x.shape
    assert jnp.allclose(pred, x)

    # With gt: outputs == (prediction, loss)  (small / single-tile path)
    pred2, loss = model(x, gt)
    loss = jax.block_until_ready(loss)
    ref_loss = jnp.mean((x - gt) ** 2)
    assert jnp.allclose(loss, ref_loss, rtol=1e-5, atol=1e-6), (loss, ref_loss)

    # Larger input: exercises the tiled, megacore-parallel reduction path
    # (grid (2, 2): parallel row-tile groups + multi-step accumulation).
    k3, k4 = jax.random.split(k2)
    xb = jax.random.normal(k3, (4, 4, 160, 256), dtype=jnp.float32)
    gtb = jax.random.normal(k4, (4, 4, 160, 256), dtype=jnp.float32)
    loss_b = jax.block_until_ready(model(xb, gtb)[1])
    ref_b = jnp.mean((xb - gtb) ** 2)
    assert jnp.allclose(loss_b, ref_b, rtol=1e-4, atol=1e-6), (loss_b, ref_b)

    print("KERNEL_OK")
</pallas_src>

<mosaic_0001>
module attributes {stable_mosaic.version = 11 : i64} {
  func.func @_mse_partial_kernel(%arg0: i32, %arg1: i32, %arg2: memref<8x512xf32, #tpu.memory_space<vmem>>, %arg3: memref<8x512xf32, #tpu.memory_space<vmem>>, %arg4: memref<1x8x128xf32, #tpu.memory_space<vmem>>, %arg5: memref<1x1xf32, #tpu.memory_space<vmem>>) attributes {dimension_semantics = [#tpu.dimension_semantics<parallel>, #tpu.dimension_semantics<arbitrary>], iteration_bounds = array<i64: 1, 1>, scalar_prefetch = 0 : i64, scratch_operands = 1 : i64, tpu.core_type = #tpu.core_type<tc>, window_params = [{transform_indices = @transform_0, window_bounds = array<i64: 8, 512>}, {transform_indices = @transform_1, window_bounds = array<i64: 8, 512>}, {transform_indices = @transform_2, window_bounds = array<i64: 1, 8, 128>}]} {
    %c0_i32 = arith.constant 0 : i32
    %0 = arith.cmpi eq, %arg1, %c0_i32 : i32
    %1 = arith.extui %0 : i1 to i32
    %c0_i32_0 = arith.constant 0 : i32
    %2 = arith.cmpi ne, %1, %c0_i32_0 : i32
    scf.if %2 {
      %cst_10 = arith.constant 0.000000e+00 : f32
      %18 = vector.broadcast %cst_10 : f32 to vector<1x1xf32>
      %c0_11 = arith.constant 0 : index
      %c0_12 = arith.constant 0 : index
      %19 = vector.load %arg5[%c0_11, %c0_12] : memref<1x1xf32, #tpu.memory_space<vmem>>, vector<1x1xf32>
      tpu.vector_store %arg5[%c0_11, %c0_12], %18 {strides = array<i32>} : memref<1x1xf32, #tpu.memory_space<vmem>>, vector<1x1xf32>,
    } else {
    }
    %c0 = arith.constant 0 : index
    %c0_1 = arith.constant 0 : index
    %3 = vector.load %arg2[%c0, %c0_1] : memref<8x512xf32, #tpu.memory_space<vmem>>, vector<8x512xf32>
    %c0_2 = arith.constant 0 : index
    %c0_3 = arith.constant 0 : index
    %4 = vector.load %arg3[%c0_2, %c0_3] : memref<8x512xf32, #tpu.memory_space<vmem>>, vector<8x512xf32>
    %5 = arith.subf %3, %4 : vector<8x512xf32>
    %c0_4 = arith.constant 0 : index
    %c0_5 = arith.constant 0 : index
    %6 = vector.load %arg5[%c0_4, %c0_5] : memref<1x1xf32, #tpu.memory_space<vmem>>, vector<1x1xf32>
    %7 = arith.mulf %5, %5 : vector<8x512xf32>
    %8 = vector.shape_cast %7 : vector<8x512xf32> to vector<1x8x512xf32>
    %cst = arith.constant dense<0.000000e+00> : vector<1xf32>
    %9 = vector.multi_reduction <add>, %8, %cst [1, 2] : vector<1x8x512xf32> to vector<1xf32>
    %10 = vector.shape_cast %9 : vector<1xf32> to vector<1x1x1xf32>
    %11 = vector.extract %10[0, 0, 0] : f32 from vector<1x1x1xf32>
    %12 = vector.broadcast %11 : f32 to vector<1x1xf32>
    %13 = arith.addf %6, %12 : vector<1x1xf32>
    %c0_6 = arith.constant 0 : index
    %c0_7 = arith.constant 0 : index
    %14 = vector.load %arg5[%c0_6, %c0_7] : memref<1x1xf32, #tpu.memory_space<vmem>>, vector<1x1xf32>
    tpu.vector_store %arg5[%c0_6, %c0_7], %13 {strides = array<i32>} : memref<1x1xf32, #tpu.memory_space<vmem>>, vector<1x1xf32>,
    %c0_i32_8 = arith.constant 0 : i32
    %15 = arith.cmpi eq, %arg1, %c0_i32_8 : i32
    %16 = arith.extui %15 : i1 to i32
    %c0_i32_9 = arith.constant 0 : i32
    %17 = arith.cmpi ne, %16, %c0_i32_9 : i32
    scf.if %17 {
      %c0_10 = arith.constant 0 : index
      %c0_11 = arith.constant 0 : index
      %18 = vector.load %arg5[%c0_10, %c0_11] : memref<1x1xf32, #tpu.memory_space<vmem>>, vector<1x1xf32>
      %19 = vector.shape_cast %18 : vector<1x1xf32> to vector<1x1x1xf32>
      %20 = vector.broadcast %19 : vector<1x1x1xf32> to vector<1x8x128xf32>
      %c0_12 = arith.constant 0 : index
      %c0_13 = arith.constant 0 : index
      %c0_14 = arith.constant 0 : index
      %21 = vector.load %arg4[%c0_12, %c0_13, %c0_14] : memref<1x8x128xf32, #tpu.memory_space<vmem>>, vector<1x8x128xf32>
      tpu.vector_store %arg4[%c0_12, %c0_13, %c0_14], %20 {strides = array<i32>} : memref<1x8x128xf32, #tpu.memory_space<vmem>>, vector<1x8x128xf32>,
    } else {
    }
    return
  }
  func.func @transform_0(%arg0: i32, %arg1: i32) -> (i32, i32) {
    %c1_i32 = arith.constant 1 : i32
    %0 = arith.muli %arg0, %c1_i32 : i32
    %1 = arith.addi %0, %arg1 : i32
    %c0_i32 = arith.constant 0 : i32
    %c0_i32_0 = arith.constant 0 : i32
    return %1, %c0_i32 : i32, i32
  }
  func.func @transform_1(%arg0: i32, %arg1: i32) -> (i32, i32) {
    %c1_i32 = arith.constant 1 : i32
    %0 = arith.muli %arg0, %c1_i32 : i32
    %1 = arith.addi %0, %arg1 : i32
    %c0_i32 = arith.constant 0 : i32
    %c0_i32_0 = arith.constant 0 : i32
    return %1, %c0_i32 : i32, i32
  }
  func.func @transform_2(%arg0: i32, %arg1: i32) -> (i32, i32, i32) {
    %c0_i32 = arith.constant 0 : i32
    %c0_i32_0 = arith.constant 0 : i32
    %c0_i32_1 = arith.constant 0 : i32
    return %arg0, %c0_i32, %c0_i32_0 : i32, i32, i32
  }
}

</mosaic_0001>

<bundles_post_ra>
// kernel: _pallas_mse.1
= control target key start
LH: loop header
LB: loop body
LE: loop exit
PB: predicated region body
PF: predicated region fallthrough
CT: control target
= control target key end

     0   :  { %vm55_vm0 = vcmask 0   ;;  %v126_v19 = vmov 0.0   ;;  %v127_v20 = vmov 0   ;;  %s172_s0 = inlined_call_operand.vmem [shape: f32[8,512], index: 0, kind: input, shape index: {}]   ;;  %s173_s1 = inlined_call_operand.vmem [shape: f32[8,512], index: 1, kind: input, shape index: {}]   ;;  %s174_s2 = inlined_call_operand.vmem [shape: f32[1,8,128], index: 2, kind: output, shape index: {}]  }
   0x1   :  { %v57_v0 = vld [vmem:[%s172_s0] sm:$0xff]  ;;  %v58_v1 = vld [vmem:[%s172_s0 + $0x8] sm:$0xff]  ;;  %v59_v2 = vld [vmem:[%s172_s0 + $0x10] sm:$0xff]  ;;  %56 = vst.msk [vmem:[#allocation2] sm:$0x1] %vm55_vm0, %v126_v19  ;;  %125 = vset.pattern.permute.xlu0 %v127_v20 }
   0x2   :  { %v60_v3 = vld [vmem:[%s172_s0 + $0x18] sm:$0xff]  ;;  %v61_v4 = vld [vmem:[%s173_s1] sm:$0xff]  ;;  %v62_v5 = vld [vmem:[%s173_s1 + $0x8] sm:$0xff] }
   0x3   :  { %v63_v6 = vld [vmem:[%s173_s1 + $0x10] sm:$0xff]  ;;  %v64_v7 = vld [vmem:[%s173_s1 + $0x18] sm:$0xff]  ;;  %v65_v8 = vsub.f32 %v57_v0, %v61_v4  ;;  %v66_v9 = vsub.f32 %v58_v1, %v62_v5 }
   0x4   :  { %v67_v10 = vsub.f32 %v59_v2, %v63_v6  ;;  %v68_v11 = vsub.f32 %v60_v3, %v64_v7 }
   0x5   :  { %v70_v12 = vmul.f32 %v65_v8, %v65_v8  ;;  %v71_v13 = vmul.f32 %v66_v9, %v66_v9 }
   0x6   :  { %v72_v14 = vmul.f32 %v67_v10, %v67_v10  ;;  %v73_v15 = vmul.f32 %v68_v11, %v68_v11 }
   0x7   :  { %v74_v16 = vadd.f32 %v71_v13, %v70_v12 }
   0x8   :  { %v69_v28 = vld [vmem:[#allocation2] sm:$0x1] }
   0x9   :  { %v75_v17 = vadd.f32 %v74_v16, %v72_v14 }
   0xb   :  { %v76_v18 = vadd.f32 %v75_v17, %v73_v15 }
   0xd   :  { %77 = vadd.xlane.f32.xlu0 %v76_v18 }
  0x9a   :  { %v78_v21 = vpop.xlane.xlu0 %77 }
  0x9b   :  { %v79_v22 = vrot.slane %v78_v21, 4 }
  0x9d   :  { %v80_v23 = vadd.f32 %v79_v22, %v78_v21 }
  0x9f   :  { %v81_v24 = vrot.slane %v80_v23, 2 }
  0xa1   :  { %v82_v25 = vadd.f32 %v81_v24, %v80_v23 }
  0xa3   :  { %v83_v26 = vrot.slane %v82_v25, 1 }
  0xa5   :  { %v84_v27 = vadd.f32 %v83_v26, %v82_v25 }
  0xa7   :  { %121 = vpush %v84_v27 }
  0xd8   :  { %s122_s0 = spop %121 }
  0xd9   :  { %v86_v29 = vstv %s122_s0 }
  0xda   :  { %v87_v30 = vadd.f32 %v86_v29, %v69_v28 }
  0xdc   :  { %89 = vst.msk [vmem:[#allocation2] sm:$0x1] %vm55_vm0, %v87_v30 }
  0xe3   :  { %v120_v31 = vld [vmem:[#allocation2] ss:$0 sm:$0xff] }
  0xe4   :  { %100 = vperm.xlu0 %125, %v120_v31  }
 0x163   :  { %v101_v32 = vpop.permute.xlu0 %100 }
 0x164   :  { %103 = vst [vmem:[%s174_s2] sm:$0xff] %v101_v32 }

</bundles_post_ra>
